<compile_context>
chip_gen: v7x
topology: tpu7x:2x2x1
jax: 0.10.0
libtpu: 0.0.40
codegen_flags: <defaults>
</compile_context>

<pallas_src>
import functools

import jax
import jax.numpy as jnp
from jax.experimental import pallas as pl
from jax.experimental.pallas import tpu as pltpu


def _attention_kernel(x_ref, wqkv_ref, wo_ref, bo_ref, o_ref,
                      *, heads, dim_head, scale):
    # x_ref:    (N, D)            current batch element (leading dim squeezed)
    # wqkv_ref: (D, 3*inner)      combined QKV projection weight
    # wo_ref:   (inner, Dp)       output projection (Dp = D padded to 128)
    # bo_ref:   (1, Dp)
    # o_ref:    (N, Dp)
    x = x_ref[...]
    cdt = x.dtype
    inner = heads * dim_head

    # (1) Fused, lane-dense QKV projection: one MXU pass of x against the
    #     combined weight; f32 accumulation.
    qkv = jnp.dot(x, wqkv_ref[...],
                  preferred_element_type=jnp.float32)               # (N, 3*inner) f32

    # (2) Per-head attention with 2-D matmuls (loop unrolled at trace time;
    #     heads is small).  Scale is folded into q.
    outs = []
    for h in range(heads):
        lo = h * dim_head
        hi = lo + dim_head
        q = (qkv[:, lo:hi] * scale).astype(cdt)                      # (N, Dh)
        k = qkv[:, inner + lo:inner + hi].astype(cdt)                # (N, Dh)
        v = qkv[:, 2 * inner + lo:2 * inner + hi].astype(cdt)        # (N, Dh)

        # Contract the shared minor dim -- no explicit k transpose.
        dots = jnp.einsum('qd,kd->qk', q, k,
                          preferred_element_type=jnp.float32)        # (N, N) f32

        # Numerically-stable softmax; only these intermediates are f32.
        m = jnp.max(dots, axis=-1, keepdims=True)
        e = jnp.exp(dots - m)
        s = jnp.sum(e, axis=-1, keepdims=True)
        attn = (e * pl.reciprocal(s, approx=True)).astype(cdt)       # (N, N)

        outs.append(jnp.einsum('qk,kd->qd', attn, v,
                               preferred_element_type=jnp.float32
                               ).astype(cdt))                         # (N, Dh)

    # Merge heads along lanes -> (N, inner), matching 'b h n d -> b n (h d)'.
    out = jnp.concatenate(outs, axis=-1)

    # (3) Output projection with the head reduction fused into the MXU
    #     accumulator: one (N, inner) @ (inner, Dp) matmul, K = inner.
    y = jnp.dot(out, wo_ref[...], preferred_element_type=jnp.float32)  # (N, Dp) f32
    o_ref[...] = (y + bo_ref[...].astype(jnp.float32)).astype(o_ref.dtype)


def attention_pallas(x, wqkv, wout, bout, *, heads, dim_head, compute_dtype=None):
    """x: (B, N, D); wqkv: (D, 3*heads*dim_head); wout: (heads*dim_head, D); bout: (D,)

    compute_dtype: optional dtype for MXU operands (e.g. jnp.bfloat16);
    accumulation is always f32.  Default: keep the input dtype.
    """
    B, N, D = x.shape
    inner = heads * dim_head
    assert wqkv.shape == (D, 3 * inner)
    assert wout.shape == (inner, D)
    scale = dim_head ** (-0.5)

    # Lane-dense output width (multiple of 128); extra columns are zero and
    # sliced off after the call (pad-with-zeros invariant keeps this exact).
    Dp = ((D + 127) // 128) * 128
    wo_p = jnp.pad(wout, ((0, 0), (0, Dp - D)))                   # (inner, Dp)
    bo_p = jnp.pad(bout, (0, Dp - D)).reshape(1, Dp)              # (1, Dp)

    cdt = jnp.dtype(compute_dtype) if compute_dtype is not None else x.dtype
    x_c = x.astype(cdt)
    wqkv_c = wqkv.astype(cdt)
    wo_c = wo_p.astype(cdt)

    kernel = functools.partial(_attention_kernel,
                               heads=heads, dim_head=dim_head, scale=scale)

    # VMEM budget: double-buffered blocks + in-kernel intermediates (+margin).
    isz = jnp.dtype(cdt).itemsize
    f32 = 4
    est = (
        2 * (N * D) * isz                       # x block
        + 2 * (D * 3 * inner) * isz             # Wqkv
        + 2 * (inner * Dp) * isz                # Wout
        + 2 * (1 * Dp) * bo_p.dtype.itemsize    # bias
        + 2 * (N * Dp) * x.dtype.itemsize       # output block
        + (N * 3 * inner) * f32                 # fused qkv (f32)
        + 4 * (N * N) * f32                     # dots / exp / attn (transient)
        + 4 * (N * inner) * isz                 # q/k/v, merged out
        + 2 * (N * Dp) * f32                    # projection accumulator
    )
    vmem_limit = int(min(max(2 * est + (4 << 20), 16 << 20), 48 << 20))

    y_pad = pl.pallas_call(
        kernel,
        out_shape=jax.ShapeDtypeStruct((B, N, Dp), x.dtype),
        grid_spec=pltpu.PrefetchScalarGridSpec(
            num_scalar_prefetch=0,
            grid=(B,),
            in_specs=[
                pl.BlockSpec((None, N, D), lambda b: (b, 0, 0)),      # x (batch squeezed)
                pl.BlockSpec((D, 3 * inner), lambda b: (0, 0)),       # Wqkv
                pl.BlockSpec((inner, Dp), lambda b: (0, 0)),          # Wout (padded)
                pl.BlockSpec((1, Dp), lambda b: (0, 0)),              # bout (padded)
            ],
            out_specs=pl.BlockSpec((None, N, Dp), lambda b: (b, 0, 0)),
        ),
        compiler_params=pltpu.CompilerParams(
            dimension_semantics=("parallel",),
            vmem_limit_bytes=vmem_limit,
        ),
    )(x_c, wqkv_c, wo_c, bo_p)

    return y_pad[..., :D]


def attention_reference(x, wqkv, wout, bout, *, heads, dim_head):
    """Pure-JAX reference mirroring the PyTorch forward."""
    B, N, D = x.shape
    inner = heads * dim_head
    scale = dim_head ** (-0.5)
    qkv = x @ wqkv                                           # (B, N, 3*inner)
    q, k, v = jnp.split(qkv, 3, axis=-1)

    def to_heads(t):                                         # 'b n (h d) -> b h n d'
        return t.reshape(B, N, heads, dim_head).transpose(0, 2, 1, 3)

    q, k, v = map(to_heads, (q, k, v))
    dots = jnp.einsum('bhnd,bhmd->bhnm', q, k) * scale
    attn = jax.nn.softmax(dots, axis=-1)
    out = jnp.einsum('bhnm,bhmd->bhnd', attn, v)
    out = out.transpose(0, 2, 1, 3).reshape(B, N, inner)     # 'b h n d -> b n (h d)'
    return out @ wout + bout


if __name__ == "__main__":
    # Small shapes consistent with the module
    B, N, D = 2, 8, 32
    heads, dim_head = 2, 16
    inner = heads * dim_head

    key = jax.random.PRNGKey(0)
    kx, kq, kw, kb = jax.random.split(key, 4)

    x = jax.random.normal(kx, (B, N, D), dtype=jnp.float32)
    # Deterministic synthetic parameters (nn.Linear shapes, stored as (in, out))
    wqkv = jax.random.normal(kq, (D, 3 * inner), dtype=jnp.float32) * (D ** -0.5)
    wout = jax.random.normal(kw, (inner, D), dtype=jnp.float32) * (inner ** -0.5)
    bout = jax.random.normal(kb, (D,), dtype=jnp.float32) * 0.01
    # TODO(synk): dropout is 0.0 (eval mode), so the to_out Dropout is an identity here.

    y_ref = attention_reference(x, wqkv, wout, bout, heads=heads, dim_head=dim_head)

    # f32 MXU operands (exact path). Tolerance absorbs the approximate EUP
    # reciprocal used for the softmax normalization; values are O(1).
    y = attention_pallas(x, wqkv, wout, bout, heads=heads, dim_head=dim_head)
    jax.block_until_ready(y)
    assert jnp.allclose(y, y_ref, atol=1e-2, rtol=1e-2), "mismatch vs reference (f32)"

    # bf16 MXU-operand path (the big compute-rate lever on v6e/v7x when the
    # caller feeds f32); looser tolerance for the bf16 operand rounding.
    y_bf16 = attention_pallas(x, wqkv, wout, bout, heads=heads, dim_head=dim_head,
                              compute_dtype=jnp.bfloat16)
    jax.block_until_ready(y_bf16)
    assert jnp.allclose(y_bf16, y_ref, atol=1e-1, rtol=1e-1), "mismatch vs reference (bf16)"

    print("KERNEL_OK")
</pallas_src>

<mosaic_0001>
module attributes {stable_mosaic.version = 11 : i64} {
  func.func @_attention_kernel(%arg0: i32, %arg1: memref<1x8x32xf32, #tpu.memory_space<vmem>>, %arg2: memref<32x96xf32, #tpu.memory_space<vmem>>, %arg3: memref<32x128xf32, #tpu.memory_space<vmem>>, %arg4: memref<1x128xf32, #tpu.memory_space<vmem>>, %arg5: memref<1x8x128xf32, #tpu.memory_space<vmem>>) attributes {dimension_semantics = [#tpu.dimension_semantics<parallel>], iteration_bounds = array<i64: 2>, scalar_prefetch = 0 : i64, scratch_operands = 0 : i64, tpu.core_type = #tpu.core_type<tc>, window_params = [{transform_indices = @transform_0, window_bounds = array<i64: 1, 8, 32>}, {pipeline_mode = #tpu.pipeline_mode<synchronous>, transform_indices = @transform_1, window_bounds = array<i64: 32, 96>}, {pipeline_mode = #tpu.pipeline_mode<synchronous>, transform_indices = @transform_2, window_bounds = array<i64: 32, 128>}, {pipeline_mode = #tpu.pipeline_mode<synchronous>, transform_indices = @transform_3, window_bounds = array<i64: 1, 128>}, {transform_indices = @transform_4, window_bounds = array<i64: 1, 8, 128>}]} {
    %c0 = arith.constant 0 : index
    %c0_0 = arith.constant 0 : index
    %c0_1 = arith.constant 0 : index
    %0 = vector.load %arg1[%c0, %c0_0, %c0_1] : memref<1x8x32xf32, #tpu.memory_space<vmem>>, vector<1x8x32xf32>
    %1 = vector.shape_cast %0 : vector<1x8x32xf32> to vector<8x32xf32>
    %c0_2 = arith.constant 0 : index
    %c0_3 = arith.constant 0 : index
    %2 = vector.load %arg2[%c0_2, %c0_3] : memref<32x96xf32, #tpu.memory_space<vmem>>, vector<32x96xf32>
    %cst = arith.constant dense<0.000000e+00> : vector<8x96xf32>
    %3 = tpu.matmul %1, %2, %cst {dimension_numbers = #tpu.dot_dimension_numbers<[1], [0], [0], [1], [0, 0, 1, 1], [], []>} : vector<8x32xf32>, vector<32x96xf32>, vector<8x96xf32> -> vector<8x96xf32>
    %4 = vector.extract_strided_slice %3 {offsets = [0, 0], sizes = [8, 16], strides = [1, 1]} : vector<8x96xf32> to vector<8x16xf32>
    %cst_4 = arith.constant 2.500000e-01 : f32
    %5 = vector.broadcast %cst_4 : f32 to vector<8x16xf32>
    %6 = arith.mulf %4, %5 : vector<8x16xf32>
    %7 = vector.extract_strided_slice %3 {offsets = [0, 32], sizes = [8, 16], strides = [1, 1]} : vector<8x96xf32> to vector<8x16xf32>
    %8 = vector.extract_strided_slice %3 {offsets = [0, 64], sizes = [8, 16], strides = [1, 1]} : vector<8x96xf32> to vector<8x16xf32>
    "tpu.trace_start"() <{level = 10 : i32, message = "qd,kd->qk"}> : () -> ()
    %cst_5 = arith.constant dense<0.000000e+00> : vector<8x8xf32>
    %9 = tpu.matmul %6, %7, %cst_5 {dimension_numbers = #tpu.dot_dimension_numbers<[1], [1], [0], [0], [0, 0, 1, 0], [], []>} : vector<8x16xf32>, vector<8x16xf32>, vector<8x8xf32> -> vector<8x8xf32>
    "tpu.trace_stop"() : () -> ()
    %cst_6 = arith.constant dense<0xFF800000> : vector<8xf32>
    %10 = vector.multi_reduction <maximumf>, %9, %cst_6 [1] : vector<8x8xf32> to vector<8xf32>
    %11 = vector.shape_cast %10 : vector<8xf32> to vector<8x1xf32>
    %12 = vector.broadcast %11 : vector<8x1xf32> to vector<8x8xf32>
    %13 = arith.subf %9, %12 : vector<8x8xf32>
    %14 = math.exp %13 : vector<8x8xf32>
    %cst_7 = arith.constant dense<0.000000e+00> : vector<8xf32>
    %15 = vector.multi_reduction <add>, %14, %cst_7 [1] : vector<8x8xf32> to vector<8xf32>
    %16 = vector.shape_cast %15 : vector<8xf32> to vector<8x1xf32>
    %17 = tpu.reciprocal %16 {approx = true} : vector<8x1xf32> -> vector<8x1xf32>
    %18 = vector.broadcast %17 : vector<8x1xf32> to vector<8x8xf32>
    %19 = arith.mulf %14, %18 : vector<8x8xf32>
    "tpu.trace_start"() <{level = 10 : i32, message = "qk,kd->qd"}> : () -> ()
    %cst_8 = arith.constant dense<0.000000e+00> : vector<8x16xf32>
    %20 = tpu.matmul %19, %8, %cst_8 {dimension_numbers = #tpu.dot_dimension_numbers<[1], [0], [0], [1], [0, 0, 1, 1], [], []>} : vector<8x8xf32>, vector<8x16xf32>, vector<8x16xf32> -> vector<8x16xf32>
    "tpu.trace_stop"() : () -> ()
    %21 = vector.extract_strided_slice %3 {offsets = [0, 16], sizes = [8, 16], strides = [1, 1]} : vector<8x96xf32> to vector<8x16xf32>
    %cst_9 = arith.constant 2.500000e-01 : f32
    %22 = vector.broadcast %cst_9 : f32 to vector<8x16xf32>
    %23 = arith.mulf %21, %22 : vector<8x16xf32>
    %24 = vector.extract_strided_slice %3 {offsets = [0, 48], sizes = [8, 16], strides = [1, 1]} : vector<8x96xf32> to vector<8x16xf32>
    %25 = vector.extract_strided_slice %3 {offsets = [0, 80], sizes = [8, 16], strides = [1, 1]} : vector<8x96xf32> to vector<8x16xf32>
    "tpu.trace_start"() <{level = 10 : i32, message = "qd,kd->qk"}> : () -> ()
    %cst_10 = arith.constant dense<0.000000e+00> : vector<8x8xf32>
    %26 = tpu.matmul %23, %24, %cst_10 {dimension_numbers = #tpu.dot_dimension_numbers<[1], [1], [0], [0], [0, 0, 1, 0], [], []>} : vector<8x16xf32>, vector<8x16xf32>, vector<8x8xf32> -> vector<8x8xf32>
    "tpu.trace_stop"() : () -> ()
    %cst_11 = arith.constant dense<0xFF800000> : vector<8xf32>
    %27 = vector.multi_reduction <maximumf>, %26, %cst_11 [1] : vector<8x8xf32> to vector<8xf32>
    %28 = vector.shape_cast %27 : vector<8xf32> to vector<8x1xf32>
    %29 = vector.broadcast %28 : vector<8x1xf32> to vector<8x8xf32>
    %30 = arith.subf %26, %29 : vector<8x8xf32>
    %31 = math.exp %30 : vector<8x8xf32>
    %cst_12 = arith.constant dense<0.000000e+00> : vector<8xf32>
    %32 = vector.multi_reduction <add>, %31, %cst_12 [1] : vector<8x8xf32> to vector<8xf32>
    %33 = vector.shape_cast %32 : vector<8xf32> to vector<8x1xf32>
    %34 = tpu.reciprocal %33 {approx = true} : vector<8x1xf32> -> vector<8x1xf32>
    %35 = vector.broadcast %34 : vector<8x1xf32> to vector<8x8xf32>
    %36 = arith.mulf %31, %35 : vector<8x8xf32>
    "tpu.trace_start"() <{level = 10 : i32, message = "qk,kd->qd"}> : () -> ()
    %cst_13 = arith.constant dense<0.000000e+00> : vector<8x16xf32>
    %37 = tpu.matmul %36, %25, %cst_13 {dimension_numbers = #tpu.dot_dimension_numbers<[1], [0], [0], [1], [0, 0, 1, 1], [], []>} : vector<8x8xf32>, vector<8x16xf32>, vector<8x16xf32> -> vector<8x16xf32>
    "tpu.trace_stop"() : () -> ()
    %38 = tpu.concatenate %20, %37 in 1 : vector<8x16xf32>, vector<8x16xf32> -> vector<8x32xf32>
    %c0_14 = arith.constant 0 : index
    %c0_15 = arith.constant 0 : index
    %39 = vector.load %arg3[%c0_14, %c0_15] : memref<32x128xf32, #tpu.memory_space<vmem>>, vector<32x128xf32>
    %cst_16 = arith.constant dense<0.000000e+00> : vector<8x128xf32>
    %40 = tpu.matmul %38, %39, %cst_16 {dimension_numbers = #tpu.dot_dimension_numbers<[1], [0], [0], [1], [0, 0, 1, 1], [], []>} : vector<8x32xf32>, vector<32x128xf32>, vector<8x128xf32> -> vector<8x128xf32>
    %c0_17 = arith.constant 0 : index
    %c0_18 = arith.constant 0 : index
    %41 = vector.load %arg4[%c0_17, %c0_18] : memref<1x128xf32, #tpu.memory_space<vmem>>, vector<1x128xf32>
    %42 = vector.broadcast %41 : vector<1x128xf32> to vector<8x128xf32>
    %43 = arith.addf %40, %42 : vector<8x128xf32>
    %c0_19 = arith.constant 0 : index
    %c0_20 = arith.constant 0 : index
    %c0_21 = arith.constant 0 : index
    %44 = vector.load %arg5[%c0_19, %c0_20, %c0_21] : memref<1x8x128xf32, #tpu.memory_space<vmem>>, vector<1x8x128xf32>
    %45 = vector.shape_cast %44 : vector<1x8x128xf32> to vector<8x128xf32>
    %46 = vector.shape_cast %43 : vector<8x128xf32> to vector<1x8x128xf32>
    tpu.vector_store %arg5[%c0_19, %c0_20, %c0_21], %46 {strides = array<i32>} : memref<1x8x128xf32, #tpu.memory_space<vmem>>, vector<1x8x128xf32>,
    return
  }
  func.func @transform_0(%arg0: i32) -> (i32, i32, i32) {
    %c0_i32 = arith.constant 0 : i32
    %c0_i32_0 = arith.constant 0 : i32
    %c0_i32_1 = arith.constant 0 : i32
    return %arg0, %c0_i32, %c0_i32_0 : i32, i32, i32
  }
  func.func @transform_1(%arg0: i32) -> (i32, i32) {
    %c0_i32 = arith.constant 0 : i32
    %c0_i32_0 = arith.constant 0 : i32
    %c0_i32_1 = arith.constant 0 : i32
    return %c0_i32, %c0_i32_0 : i32, i32
  }
  func.func @transform_2(%arg0: i32) -> (i32, i32) {
    %c0_i32 = arith.constant 0 : i32
    %c0_i32_0 = arith.constant 0 : i32
    %c0_i32_1 = arith.constant 0 : i32
    return %c0_i32, %c0_i32_0 : i32, i32
  }
  func.func @transform_3(%arg0: i32) -> (i32, i32) {
    %c0_i32 = arith.constant 0 : i32
    %c0_i32_0 = arith.constant 0 : i32
    %c0_i32_1 = arith.constant 0 : i32
    return %c0_i32, %c0_i32_0 : i32, i32
  }
  func.func @transform_4(%arg0: i32) -> (i32, i32, i32) {
    %c0_i32 = arith.constant 0 : i32
    %c0_i32_0 = arith.constant 0 : i32
    %c0_i32_1 = arith.constant 0 : i32
    return %arg0, %c0_i32, %c0_i32_0 : i32, i32, i32
  }
}

</mosaic_0001>

<bundles_post_ra>
// kernel: tpu_custom_call.1
= control target key start
LH: loop header
LB: loop body
LE: loop exit
PB: predicated region body
PF: predicated region fallthrough
CT: control target
= control target key end

     0   :  { %9 = vsyncpa [#allocation3], 0  ;;  %s1487_s0 = inlined_call_operand.hbm [shape: f32[2,8,32], index: 0, kind: input, shape index: {}]   ;;  %s1488_s1 = inlined_call_operand.hbm [shape: f32[32,96], index: 1, kind: input, shape index: {}]   ;;  %s1489_s2 = inlined_call_operand.hbm [shape: f32[32,128], index: 2, kind: input, shape index: {}]   ;;  %s1490_s3 = inlined_call_operand.vmem [shape: f32[1,128], index: 3, kind: input, shape index: {}]   ;;  %s1491_s4 = inlined_call_operand.hbm [shape: f32[2,8,128], index: 4, kind: output, shape index: {}]  }
   0x1   :  { %11 = vsyncpa [#allocation3 + $0x1], 0 }
   0x2   :  { %12 = vsyncpa [#allocation6], 0 }
   0x3   :  { %13 = vsyncpa [#allocation4], 0 }
   0x4   :  { %15 = vsyncpa [#allocation4 + $0x1], 0  ;;  %s1228_s15 = smov 0   ;;  %s1230_s16 = smov 0  }
   0x5   :  { %s1232_s17 = smov 0   ;;  %s1234_s18 = smov 0  }
   0x6 LB: > { %s1249_s19 = sadd.s32 4294967295, %s1186_s18   ;;  %s847_s20 = sadd.s32 4294967294, %s1186_s18   ;;  %s1186_s18 = sphi %s1234_s18, %s1511_s18   ;;  %s1182_s17 = sphi %s1232_s17, %s1510_s17   ;;  %s1178_s16 = sphi %s1230_s16, %s1509_s16   ;;  %s1174_s15 = sphi %s1228_s15, %s1508_s15  }
   0x7   : > { %p41_p0 = scmp.ne.s32.totalorder %s1178_s16, %s1174_s15  ;;  %p1492_p1 = scmp.eq.s32.totalorder %s1249_s19, 0 }
   0x8   : > { %p134_p3 = scmp.eq.s32.totalorder %s847_s20, 1  ;;  %p848_p5 = scmp.ge.s32.totalorder %s1186_s18, 1 }
   0x9   : > { %p1258_p4 = por %p1492_p1, %p41_p0  ;;  %p141_p7 = scmp.lt.s32.totalorder %s1186_s18, 3 }
   0xa   : > { %p1263_p6 = por %p134_p3, %p41_p0  ;;  %s1188_s24 = smov [#allocation5]  }
   0xb   : > { %s1495_s21 = scalar_select %p1258_p4, 1, 0 }
   0xc   : > { %s1496_s22 = scalar_select %p1263_p6, 1, 0 }
   0xd   : > { %p1268_p8 = pnand %p848_p5, %p141_p7  ;;  %s153_s25 = sshll.u32 %s1188_s24, 4  ;;  %s1272_s25 = int_to_ptr.vmem [resolvable:$true] %s153_s25 }
   0xe   : > { %s1189_s27 = smov [#allocation7]   ;;  %s1030_s5 = scalar_lea.hbm %s1488_s1, 512 }
   0xf   : > { %p956_p9 = pneg %p1268_p8  ;;  %s166_s28 = sshll.u32 %s1189_s27, 4  ;;  %s1283_s28 = int_to_ptr.vmem [resolvable:$true] %s166_s28 }
  0x10   : > { %p1031_p12 = scmp.ne.s32.totalorder %s1488_s1, %s1030_s5  ;;  %p1037_p5 = scmp.lt.u32.totalorder %s1030_s5, %s1488_s1 }
  0x11   : > { %p1279_p11 = pnand %p956_p9, %p1492_p1 }
  0x13   : > { %p1032_p13 = pneg %p1279_p11 }
  0x15   : > { %p1033_p0 = pnand %p1032_p13, %p1031_p12 }
  0x17   : > { %p1034_p3 = pneg %p1033_p0 }
  0x19   : > { %p1039_p7 = pnand %p1037_p5, %p1034_p3 }
  0x1b   : > { %1042 = shalt.err (!%p1039_p7)
}
  0x1c   : > { %s1043_s10 = scalar_lea.vmem %s1272_s25, 512  ;;  %p1051_p2 = scmp.lt.s32.totalorder %s1272_s25, %s1272_s25 }
  0x1d   : > { %p1044_p9 = scmp.ne.s32.totalorder %s1272_s25, %s1043_s10  ;;  %p1052_p12 = scmp.lt.s32.totalorder %s1043_s10, %s1043_s10 }
  0x1f   : > { %p1046_p10 = pnand %p1044_p9, %p1032_p13  ;;  %p1053_p0 = por %p1052_p12, %p1051_p2 }
  0x21   : > { %p1047_p1 = pneg %p1046_p10 }
  0x23   : > { %p1054_p6 = pnand %p1053_p0, %p1047_p1 }
  0x25   : > { %1057 = shalt.err (!%p1054_p6)
}
  0x26   : > { %s1190_s11 = smov 128   ;;  %s1191_s12 = smov 8  }
  0x27   : > { %959 = dma.hbm_to_vmem [thread:$0]  (!%p1279_p11), %s1488_s1, 512, %s1272_s25, [#allocation6], %s1190_s11, %s1190_s11, %s1191_s12  }
  0x28   : > { %s1058_s27 = scalar_lea.hbm %s1489_s2, 512 }
  0x29   : > { %p1059_p2 = scmp.ne.s32.totalorder %s1489_s2, %s1058_s27  ;;  %p1065_p10 = scmp.lt.u32.totalorder %s1058_s27, %s1489_s2 }
  0x2b   : > { %p1061_p1 = pnand %p1059_p2, %p1032_p13 }
  0x2d   : > { %p1062_p6 = pneg %p1061_p1 }
  0x2f   : > { %p1067_p3 = pnand %p1065_p10, %p1062_p6 }
  0x31   : > { %1070 = shalt.err (!%p1067_p3)
}
  0x32   : > { %s1071_s25 = scalar_lea.vmem %s1283_s28, 512  ;;  %p1079_p12 = scmp.lt.s32.totalorder %s1283_s28, %s1283_s28 }
  0x33   : > { %p1072_p5 = scmp.ne.s32.totalorder %s1283_s28, %s1071_s25  ;;  %p1080_p0 = scmp.lt.s32.totalorder %s1071_s25, %s1071_s25 }
  0x35   : > { %p1074_p7 = pnand %p1072_p5, %p1032_p13  ;;  %p1081_p2 = por %p1080_p0, %p1079_p12 }
  0x37   : > { %p1075_p9 = pneg %p1074_p7 }
  0x39   : > { %p1082_p1 = pnand %p1081_p2, %p1075_p9 }
  0x3b   : > { %1085 = shalt.err (!%p1082_p1)
}
  0x3c   : > { %962 = dma.hbm_to_vmem [thread:$0]  (!%p1279_p11), %s1489_s2, 512, %s1283_s28, [#allocation6], %s1190_s11, %s1190_s11, %s1191_s12  }
  0x3d   : > { %s1338_s9 = sadd.s32 1, %s1186_s18   ;;  %s28_s26 = sadd.s32 1, %s1182_s17 }
  0x3e   : > { %s25_s10 = ssub.s32 %s1186_s18, %s1338_s9  ;;  %p35_p13 = scmp.ne.s32.totalorder %s1182_s17, %s1178_s16 }
  0x3f   : > { %p26_p6 = scmp.eq.s32.totalorder %s25_s10, 0  ;;  %p36_p10 = scmp.eq.s32.totalorder %s1186_s18, 0 }
  0x40   : > { %p1499_p3 = scmp.eq.s32.totalorder %s1249_s19, 1  ;;  %p973_p7 = scmp.lt.s32.totalorder %s1186_s18, 2 }
  0x41   : > { %s1354_s14 = scalar_select %p26_p6, %s1182_s17, %s28_s26  }
  0x42   : > { %p1348_p5 = por %p1499_p3, %p35_p13  ;;  %p37_p9 = por %p36_p10, %p35_p13 }
  0x43   : > { %s183_s20 = sand.u32 1, %s1182_s17   ;;  %s853_s28 = sshll.u32 %s1186_s18, 7 }
  0x44   : > { %s1500_s13 = scalar_select %p1348_p5, 1, 0 }
  0x45   : > { %s852_s24 = sshll.u32 %s183_s20, 3  ;;  %s1361_s27 = scalar_lea.hbm %s1487_s0, %s853_s28 }
  0x46   : > { %s187_s29 = scalar_lea.vmem [#allocation2], %s852_s24  ;;  %p1365_p11 = pnand %p973_p7, %p37_p9 }
  0x47   : > { %s194_s30 = sshll.u32 %s187_s29, 4  ;;  %s184_s6 = scalar_lea.sflag [#allocation3], %s183_s20  ;;  %s1363_s30 = int_to_ptr.vmem [resolvable:$true] %s194_s30 }
  0x48   : > { %s1086_s25 = scalar_lea.hbm %s1361_s27, 128  ;;  %p1088_p0 = pneg %p1365_p11 }
  0x49   : > { %p1087_p12 = scmp.ne.s32.totalorder %s1361_s27, %s1086_s25  ;;  %s1091_s26 = scalar_lea.hbm %s1487_s0, 256 }
  0x4a   : > { %p1092_p13 = scmp.lt.u32.totalorder %s1361_s27, %s1487_s0  ;;  %p1093_p6 = scmp.lt.u32.totalorder %s1091_s26, %s1086_s25 }
  0x4b   : > { %p1089_p2 = pnand %p1088_p0, %p1087_p12  ;;  %p1095_p3 = scmp.lt.u32.totalorder %s1086_s25, %s1361_s27 }
  0x4c   : > { %p1094_p10 = por %p1093_p6, %p1092_p13 }
  0x4d   : > { %p1090_p1 = pneg %p1089_p2 }
  0x4e   : > { %p1096_p7 = por %p1095_p3, %p1094_p10 }
  0x50   : > { %p1097_p9 = pnand %p1096_p7, %p1090_p1 }
  0x52   : > { %1100 = shalt.err (!%p1097_p9)
}
  0x53   : > { %s1101_s20 = scalar_lea.vmem %s1363_s30, 128  ;;  %s1192_s28 = smov [#allocation2]  }
  0x54   : > { %p1102_p12 = scmp.ne.s32.totalorder %s1363_s30, %s1101_s20  ;;  %s1106_s11 = sshll.u32 %s1192_s28, 4  ;;  %s1107_s11 = int_to_ptr.vmem [resolvable:$false] %s1106_s11 }
  0x55   : > { %s1108_s12 = scalar_lea.vmem %s1107_s11, 256  ;;  %p1109_p4 = scmp.lt.s32.totalorder %s1363_s30, %s1107_s11 }
  0x56   : > { %p1104_p2 = pnand %p1102_p12, %p1088_p0  ;;  %p1110_p13 = scmp.lt.s32.totalorder %s1108_s12, %s1101_s20 }
  0x58   : > { %p1105_p5 = pneg %p1104_p2  ;;  %p1111_p6 = por %p1110_p13, %p1109_p4 }
  0x5a   : > { %p1112_p10 = pnand %p1111_p6, %p1105_p5 }
  0x5c   : > { %1115 = shalt.err (!%p1112_p10)
}
  0x5d   : > { %966 = dma.hbm_to_vmem [thread:$0]  (!%p1365_p11), %s1361_s27, 128, %s1363_s30, %s184_s6  }
  0x5e   : > { %203 = sbr.rel (%p1268_p8) target bundleno = 2057 (0x809), region = 36  ;;  %s1397_s29 = sand.u32 (!%p1268_p8), 1, %s1178_s16  }
  0x5f   : > { %s855_s25 = sshll.u32 (!%p1268_p8), %s1397_s29, 3  ;;  %s206_s7 = scalar_lea.sflag (!%p1268_p8), [#allocation3], %s1397_s29 }
  0x60   : > { %s209_s8 = scalar_lea.vmem (!%p1268_p8), [#allocation2], %s855_s25  ;;  %p1502_p4 = scmp.ne.s32.totalorder (!%p1268_p8), %s1495_s21, 0 }
  0x65   : > { %1161 = dma.done.wait (%p1502_p4), %s206_s7, 128  }
  0x66   : > { %1163 = vsyncadd (%p1502_p4), %s206_s7, 4294967168  ;;  %p1503_p5 = scmp.eq.s32.totalorder %s1249_s19, 0 }
  0x68   : > { %1165 = dma.done.wait (%p1503_p5), [#allocation6], 1024   ;;  %p1504_p8 = pmov %p1503_p5 }
  0x69   : > { %v1193_v0 = vmov 0.0|0.0   ;;  %vm1194_vm0 = vmmov 0   ;;  %v1195_v1 = vmov 0.0   ;;  %v243_v2 = vld [vmem:[#allocation5] sm:$0xff]  ;;  %v244_v3 = vld [vmem:[#allocation5 + $0x8] sm:$0xff]  ;;  %v245_v4 = vld [vmem:[#allocation5 + $0x10] sm:$0xff] }
  0x6a   : > { %1167 = vsyncadd (%p1504_p8), [#allocation6], 4294966272  ;;  %932 = vmatprep.subr.bf16.mxu0 %v1193_v0  ;;  %898 = vmatprep.mubr.msk.f32.mxu0 %vm1194_vm0, %v1195_v1  ;;  %v933_v5 = vpack.c.bf16 %v244_v3, %v243_v2  ;;  %v246_v6 = vld [vmem:[#allocation5 + $0x18] sm:$0xff]  ;;  %vm247_vm1 = vcmask 261120   ;;  %s1196_s21 = smov 64   ;;  %s1197_s23 = smov 96  }
  0x6b   : > { %901 = vmatprep.subr.mxu1 %v1195_v1  ;;  %903 = vmatprep.mubr.msk.f32.mxu1 %vm1194_vm0, %v1195_v1  ;;  %v936_v7 = vpack.c.bf16 %v246_v6, %v245_v4  ;;  %v242_v8 = vld [vmem:[%s209_s8] sm:$0xff]  ;;  %s1198_s27 = smov 80   ;;  %vm325_vm2 = vcmask 130048   ;;  %vm401_vm3 = vcmask 64512   ;;  %s1199_s30 = smov 112   ;;  %v659_v41 = vld [vmem:[#allocation7] sm:$0xff] }
  0x6c   : > { %934 = vmatpush3.bf16.msra.mxu0 %v933_v5  ;;  %s1200_s5 = smov 48   ;;  %v660_v42 = vld [vmem:[#allocation7 + $0x8] sm:$0xff]  ;;  %v661_v43 = vld [vmem:[#allocation7 + $0x10] sm:$0xff]  ;;  %v662_v45 = vld [vmem:[#allocation7 + $0x18] sm:$0xff]  ;;  %s1201_s6 = smov 16  }
  0x6d   : > { %935 = vmatprep.subr.bf16.mxu0 %v1193_v0  ;;  %v939_v44 = vpack.c.bf16 %v660_v42, %v659_v41  ;;  %v942_v46 = vpack.c.bf16 %v662_v45, %v661_v43  ;;  %v866_v51 = vld [vmem:[%s1490_s3] ss:$0 sm:$0xff]  ;;  %s869_s24 = sshll.u32 %s1249_s19, 7  ;;  %s241_s20 = scalar_lea.vmem [#allocation8], %s855_s25 }
  0x6e   : > { %s758_s28 = sshll.u32 %s241_s20, 4  ;;  %s1443_s7 = scalar_lea.hbm %s1491_s4, %s869_s24  ;;  %s1445_s28 = int_to_ptr.vmem [resolvable:$true] %s758_s28 }
  0x6f   : > { %s745_s8 = scalar_lea.sflag [#allocation4], %s1397_s29  ;;  %p1505_p0 = scmp.ne.s32.totalorder %s1500_s13, 0 }
  0x70   : > { %937 = vmatpush3.bf16.msra.mxu0 %v936_v7  ;;  %s1202_s19 = smov [#allocation8]  }
  0x71   : > { %938 = vmatprep.subr.bf16.mxu0 %v1193_v0  ;;  %s1120_s25 = sshll.u32 %s1202_s19, 4  ;;  %s1121_s25 = int_to_ptr.vmem [resolvable:$false] %s1120_s25 }
  0x72   : > { %p1123_p7 = scmp.lt.s32.totalorder %s1445_s28, %s1121_s25 }
  0x73   : > { %899 = vmatmul.mubr.msk.f32.vlgmr.msra.gmra.mrb[0].mxu0 %vm247_vm1, %v242_v8 }
  0x74   : > { %929 = vmatprep.mubr.msk.f32.mxu0 %vm1194_vm0, %v1195_v1  ;;  %940 = vmatpush3.bf16.msra.mxu0 %v939_v44 }
  0x75   : > { %941 = vmatprep.subr.bf16.mxu0 %v1193_v0 }
  0x78   : > { %943 = vmatpush3.bf16.msra.mxu0 %v942_v46 }
 0x146   : > { %v317_v9 = vpop.f32.mrb[0].mxu0 }
 0x147   : > { %413 = vrot.lane.b32.xlu1 %v317_v9, %s1196_s21  ;;  %323 = vrot.lane.b32.xlu0 %v317_v9, %s1197_s23  ;;  %v900_v10 = vpop.f32.mrb[1].mxu0  ;;  %v321_v12 = vmul.f32 0.25, %v317_v9  ;;  %s1116_s21 = scalar_lea.vmem %s1445_s28, 128  ;;  %s1122_s23 = scalar_lea.vmem %s1121_s25, 256 }
 0x148   : > { %p1117_p11 = scmp.ne.s32.totalorder %s1445_s28, %s1116_s21  ;;  %p1124_p9 = scmp.lt.s32.totalorder %s1122_s23, %s1116_s21 }
 0x14a   : > { %p1118_p1 = pnand %p1117_p11, %p1505_p0  ;;  %p1125_p12 = por %p1124_p9, %p1123_p7 }
 0x14b   : > { %491 = vrot.lane.b32.xlu1 %v317_v9, %s1198_s27 }
 0x14c   : > { %p1119_p3 = pneg %p1118_p1 }
 0x14e   : > { %p1126_p2 = pnand %p1125_p12, %p1119_p3 }
 0x1b9   : > { %v324_v11 = vpop.permute.xlu0 %323  ;;  %v414_v13 = vpop.permute.xlu1 %413 }
 0x1ba   : > { %902 = vmatpush3.xpose.msk.msra.mxu1 %vm325_vm2, %v324_v11 }
 0x1bb   : > { %906 = vmatprep.subr.mxu1 %v1195_v1 }
 0x1bd   : > { %904 = vmatmul.mubr.msk.f32.vlgmr.msra.gmra.mrb[0].mxu1 %vm325_vm2, %v321_v12  ;;  %v492_v22 = vpop.permute.xlu1 %491 }
 0x1be   : > { %907 = vmatpush3.msra.mxu1 %v414_v13  ;;  %908 = vmatprep.mubr.msk.f32.mxu1 %vm1194_vm0, %v1195_v1 }
 0x1bf   : > { %911 = vmatprep.subr.mxu1 %v1195_v1 }
 0x290   : > { %v397_v14 = vpop.f32.mrb[0].mxu1 }
 0x291   : > { %v905_v15 = vpop.f32.mrb[1].mxu1  ;;  %v402_v16 = vsel %vm401_vm3, %v397_v14, -inf }
 0x292   : > { %403 = vmax.xlane.f32.xlu0 %v402_v16 }
 0x31f   : > { %v404_v17 = vpop.xlane.xlu0 %403 }
 0x320   : > { %v405_v18 = vsub.f32 %v397_v14, %v404_v17 }
 0x322   : > { %v406_v19 = vmul.f32 1.442695, %v405_v18 }
 0x324   : > { %1022 = vpow2.f32 %v406_v19 }
 0x32e   : > { %v1023_v20 = vpop.eup %1022 }
 0x32f   : > { %v408_v21 = vsel %vm401_vm3, %v1023_v20, 0.0 }
 0x330   : > { %409 = vadd.xlane.f32.xlu1 %v408_v21 }
 0x341   : > { %489 = vrot.lane.b32.xlu1 %v321_v12, %s1199_s30 }
 0x3bd   : > { %v410_v23 = vpop.xlane.xlu1 %409 }
 0x3be   : > { %1024 = vrcp.f32 %v410_v23 }
 0x3c1   : > { %v490_v26 = vpop.permute.xlu1 %489 }
 0x3c8   : > { %v1025_v24 = vpop.eup %1024 }
 0x3c9   : > { %v412_v25 = vmul.f32 %v1025_v24, %v1023_v20 }
 0x3cb   : > { %909 = vmatmul.mubr.msk.f32.vlgmr.msra.gmra.mrb[2].mxu1 %vm401_vm3, %v412_v25 }
 0x3cc   : > { %912 = vmatpush3.xpose.msk.msra.mxu1 %vm325_vm2, %v492_v22  ;;  %913 = vmatprep.mubr.msk.f32.mxu1 %vm1194_vm0, %v1195_v1 }
 0x3cd   : > { %916 = vmatprep.subr.mxu1 %v1195_v1 }
 0x3cf   : > { %914 = vmatmul.mubr.msk.f32.vlgmr.msra.gmra.mrb[4].mxu1 %vm325_vm2, %v490_v26 }
 0x3d0   : > { %918 = vmatprep.mubr.msk.f32.mxu1 %vm1194_vm0, %v1195_v1 }
 0x49e   : > { %v485_v27 = vpop.f32.mrb[2].mxu1 }
 0x49f   : > { %v910_v28 = vpop.f32.mrb[3].mxu1 }
 0x4a2   : > { %v563_v29 = vpop.f32.mrb[4].mxu1 }
 0x4a3   : > { %v915_v30 = vpop.f32.mrb[5].mxu1  ;;  %v567_v31 = vsel %vm401_vm3, %v563_v29, -inf }
 0x4a4   : > { %568 = vmax.xlane.f32.xlu1 %v567_v31 }
 0x531   : > { %v569_v32 = vpop.xlane.xlu1 %568 }
 0x532   : > { %v570_v33 = vsub.f32 %v563_v29, %v569_v32 }
 0x534   : > { %v571_v34 = vmul.f32 1.442695, %v570_v33 }
 0x536   : > { %1026 = vpow2.f32 %v571_v34 }
 0x540   : > { %v1027_v35 = vpop.eup %1026 }
 0x541   : > { %v573_v36 = vsel %vm401_vm3, %v1027_v35, 0.0 }
 0x542   : > { %574 = vadd.xlane.f32.xlu0 %v573_v36 }
 0x558   : > { %578 = vrot.lane.b32.xlu0 %v317_v9, %s1200_s5 }
 0x5cf   : > { %v575_v37 = vpop.xlane.xlu0 %574 }
 0x5d0   : > { %1028 = vrcp.f32 %v575_v37 }
 0x5d3   : > { %v579_v38 = vpop.permute.xlu0 %578 }
 0x5d4   : > { %917 = vmatpush3.msra.mxu1 %v579_v38 }
 0x5da   : > { %v1029_v39 = vpop.eup %1028 }
 0x5db   : > { %v577_v40 = vmul.f32 %v1029_v39, %v1027_v35 }
 0x5dd   : > { %919 = vmatmul.mubr.msk.f32.vlgmr.msra.gmra.mrb[6].mxu1 %vm401_vm3, %v577_v40 }
 0x6b0   : > { %v650_v47 = vpop.f32.mrb[6].mxu1 }
 0x6b1   : > { %655 = vrot.lane.b32.xlu0 %v650_v47, %s1201_s6  ;;  %v920_v48 = vpop.f32.mrb[7].mxu1 }
 0x723   : > { %v656_v49 = vpop.permute.xlu0 %655 }
 0x724   : > { %v658_v50 = vsel %vm325_vm2, %v485_v27, %v656_v49 }
 0x725   : > { %930 = vmatmul.mubr.msk.f32.vlgmr.msra.gmra.mrb[2].mxu0 %vm247_vm1, %v658_v50 }
 0x7f8   : > { %v739_v52 = vpop.f32.mrb[2].mxu0 }
 0x7f9   : > { %v740_v53 = vadd.f32 %v866_v51, %v739_v52  ;;  %v931_v54 = vpop.f32.mrb[3].mxu0 }
 0x7fb   : > { %743 = vst [vmem:[%s241_s20] sm:$0xff] %v740_v53 }
 0x7fc   : > { %1129 = shalt.err (!%p1126_p2)
}
 0x7fd   : > { %s1130_s29 = scalar_lea.hbm %s1443_s7, 128  ;;  %s1134_s5 = scalar_lea.hbm %s1491_s4, 256 }
 0x7fe   : > { %p1131_p13 = scmp.ne.s32.totalorder %s1443_s7, %s1130_s29  ;;  %p1135_p4 = scmp.lt.u32.totalorder %s1443_s7, %s1491_s4 }
 0x7ff   : > { %p1136_p5 = scmp.lt.u32.totalorder %s1134_s5, %s1130_s29  ;;  %p1138_p11 = scmp.lt.u32.totalorder %s1130_s29, %s1443_s7 }
 0x800   : > { %p1132_p6 = pnand %p1131_p13, %p1505_p0 }
 0x801   : > { %p1137_p8 = por %p1136_p5, %p1135_p4 }
 0x802   : > { %p1133_p10 = pneg %p1132_p6 }
 0x803   : > { %p1139_p1 = por %p1138_p11, %p1137_p8 }
 0x805   : > { %p1140_p3 = pnand %p1139_p1, %p1133_p10 }
 0x807   : > { %1143 = shalt.err (!%p1140_p3)
}
 0x808   : > { %954 = dma.vmem_to_hbm [thread:$0]  (%p1505_p0), %s1445_s28, 128, %s1443_s7, %s745_s8  }
 0x809 PF: > { %s770_s10 = sand.u32 1, %s1174_s15   ;;  %p1506_p7 = scmp.ne.s32.totalorder %s1496_s22, 0 }
 0x80a   : > { %p1507_p9 = scmp.ge.s32.totalorder %s1186_s18, 2  ;;  %s771_s24 = scalar_lea.sflag [#allocation4], %s770_s10 }
 0x80c   : > { %p968_p12 = pnand %p1507_p9, %p1506_p7 }
 0x80e   : > { %1169 = dma.done.wait (!%p968_p12), %s771_s24, 128  }
 0x80f   : > { %1171 = vsyncadd (!%p968_p12), %s771_s24, 4294967168  ;;  %p18_p2 = scmp.ge.s32.totalorder %s1338_s9, 4   ;;  %s1508_s15 = smov %s1178_s16 }
 0x810   : > { %s1509_s16 = smov %s1182_s17  ;;  %s1510_s17 = smov %s1354_s14 }
 0x811   : > { %s1511_s18 = smov %s1338_s9  ;;  %20 = sbr.rel (!%p18_p2) target bundleno = 6 (0x6), region = 89 }
 0x818   :  { %776 = vsyncpa [#allocation3], 1 }
 0x819   :  { %778 = vsyncpa [#allocation3 + $0x1], 1 }
 0x81a   :  { %779 = vsyncpa [#allocation6], 1 }
 0x81b   :  { %780 = vsyncpa [#allocation4], 1 }
 0x81c   :  { %782 = vsyncpa [#allocation4 + $0x1], 1 }

</bundles_post_ra>
